<compile_context>
chip_gen: v7x
topology: tpu7x:2x2x1
jax: 0.10.0
libtpu: 0.0.40
codegen_flags: <defaults>
</compile_context>

<pallas_src>
import functools

import jax
import jax.numpy as jnp
from jax.experimental import pallas as pl
from jax.experimental.pallas import tpu as pltpu

EPS = 1e-5  # nn.LayerNorm default eps


def _round_up(x, m):
    return ((x + m - 1) // m) * m


def _fused_kernel(x_ref, w_ref, g_ref, b_ref, o_ref, acc_ref, *,
                  h_real, h_pad, tk, num_k, mx_dtype):
    """grid = (row_blocks, k_blocks); K innermost ('arbitrary')."""
    k = pl.program_id(1)

    @pl.when(k == 0)
    def _init():
        acc_ref[...] = jnp.zeros_like(acc_ref)

    x_slab = x_ref[...]

    # MXU: accumulate this contraction slab in f32 (bf16 operands).
    acc_ref[...] += jnp.dot(x_slab.astype(mx_dtype), w_ref[...],
                            preferred_element_type=jnp.float32)

    # Residual fused per-K step (dropout = identity in eval mode): the LHS
    # slab IS the k-th column strip of the residual x, so add it into the
    # matching strip of the accumulator.  Static slices via a pl.when ladder
    # (num_k is small), so no dynamic lane-offset stores are needed.
    if num_k == 1:
        acc_ref[...] += x_slab.astype(jnp.float32)
    else:
        for kk in range(num_k):
            @pl.when(k == kk)
            def _add_res(kk=kk):
                acc_ref[:, kk * tk:(kk + 1) * tk] += x_slab.astype(jnp.float32)

    @pl.when(k == num_k - 1)
    def _epilogue():
        h = acc_ref[...]                       # residual + projection, f32
        inv_n = jnp.float32(1.0 / h_real)
        mean = jnp.sum(h, axis=-1, keepdims=True) * inv_n
        d = h - mean
        # Two-pass (centered) variance.  Padded lanes of h are exactly zero,
        # so each contributes mean^2 to the centered sum of squares; subtract
        # that closed-form correction instead of masking / re-materializing h.
        ssq = jnp.sum(d * d, axis=-1, keepdims=True)
        var = (ssq - jnp.float32(h_pad - h_real) * mean * mean) * inv_n
        inv_std = jax.lax.rsqrt(jnp.maximum(var, 0.0) + EPS)
        o_ref[...] = (d * inv_std * g_ref[...] + b_ref[...]).astype(o_ref.dtype)


def _tpu_vmem_capacity_bytes():
    try:
        return int(pltpu.get_tpu_info().vmem_capacity_bytes)
    except Exception:
        try:
            kind = jax.devices()[0].device_kind.lower()
        except Exception:
            kind = ""
        if "v5" in kind or "v6" in kind:
            return 128 << 20
        return 64 << 20  # conservative (v7x-like)


def sublayer_connection(x, w, gamma, beta):
    """Fused LayerNorm(x + x @ w)  (eval-mode dropout == identity).

    x: [B, S, H]; w: [H, H] (stands in for sublayer(x)[0]); gamma/beta: [H].
    """
    B, S, H = x.shape
    rows = B * S
    isz_x = jnp.dtype(x.dtype).itemsize
    isz_o = isz_x

    # MXU operand dtype: bf16 for f32 inputs (all math outside the dot stays
    # f32), otherwise the native narrow dtype.
    mx_dtype = jnp.bfloat16 if x.dtype == jnp.float32 else x.dtype
    isz_w = jnp.dtype(mx_dtype).itemsize

    # Lane-dense hidden dim (pad only when H is not a multiple of 128).
    Hp = _round_up(H, 128)

    # ---- generation-aware budgets ------------------------------------------
    vmem_cap = _tpu_vmem_capacity_bytes()
    if vmem_cap >= (96 << 20):        # v5e / v6e: 128 MiB VMEM, 1 TC per chip
        budget = 88 << 20
        limit_cap = 112 << 20
        row_cap = 512
        min_row_blocks = 1
        w_resident_budget = 48 << 20
    else:                             # v7x: 64 MiB VMEM per TC, 2 TC per chip
        budget = 38 << 20
        limit_cap = 52 << 20
        row_cap = 256
        min_row_blocks = 2
        w_resident_budget = 24 << 20

    def blocks_vmem(tm, tk):
        return (2 * tm * tk * isz_x        # x slabs, double buffered
                + 2 * tk * Hp * isz_w      # W, double buffered
                + 2 * tm * Hp * isz_o      # output, double buffered
                + 4 * Hp * 4               # gamma / beta (f32)
                + tm * Hp * 4)             # f32 accumulator scratch

    # ---- contraction tile: keep W resident (single K block) when it fits ----
    if 2 * Hp * Hp * isz_w <= w_resident_budget and blocks_vmem(128, Hp) <= budget:
        tk = Hp
    else:
        tk = next((t for t in (512, 256, 384, 128)
                   if Hp % t == 0 and blocks_vmem(128, t) <= budget), 128)
    num_k = Hp // tk

    # ---- row tile ------------------------------------------------------------
    gran = 8 if isz_x >= 4 else (16 if isz_x == 2 else 32)   # sublane packing
    tm = min(row_cap, _round_up(rows, gran))
    while tm > 128 and blocks_vmem(tm, tk) > budget:
        tm = max(128, _round_up(tm // 2, gran))
    # v7x only: keep >= 2 row blocks so the "parallel" axis feeds both TCs,
    # but never drop below the 128-row MXU-filling floor.
    if min_row_blocks > 1 and rows >= min_row_blocks * 128:
        while tm > 128 and -(-rows // tm) < min_row_blocks:
            tm = max(128, _round_up(tm // 2, gran))
    tm = min(tm, _round_up(rows, gran))
    # Avoid the wrapper-side row pad when a nearby tile divides rows exactly.
    if rows % tm != 0:
        for cand in range(tm, max(gran, tm // 2) - 1, -gran):
            if cand > 0 and rows % cand == 0:
                tm = cand
                break
    rows_p = _round_up(rows, tm)

    # ---- pad / cast operands -------------------------------------------------
    x2 = x.reshape(rows, H)
    if rows_p != rows or Hp != H:
        x2 = jnp.pad(x2, ((0, rows_p - rows), (0, Hp - H)))
    w_c = w.astype(mx_dtype)
    if Hp != H:
        w_c = jnp.pad(w_c, ((0, Hp - H), (0, Hp - H)))
    g2 = jnp.pad(gamma.astype(jnp.float32), (0, Hp - H)).reshape(1, Hp)
    b2 = jnp.pad(beta.astype(jnp.float32), (0, Hp - H)).reshape(1, Hp)

    grid = (rows_p // tm, num_k)
    vmem_limit = int(min(limit_cap, max(32 << 20, blocks_vmem(tm, tk) * 3 // 2)))

    kernel = functools.partial(_fused_kernel, h_real=H, h_pad=Hp, tk=tk,
                               num_k=num_k, mx_dtype=mx_dtype)

    out = pl.pallas_call(
        kernel,
        out_shape=jax.ShapeDtypeStruct((rows_p, Hp), x.dtype),
        grid_spec=pltpu.PrefetchScalarGridSpec(
            num_scalar_prefetch=0,
            grid=grid,
            in_specs=[
                pl.BlockSpec((tm, tk), lambda i, k: (i, k)),   # x slabs (LHS + residual)
                pl.BlockSpec((tk, Hp), lambda i, k: (k, 0)),   # W (resident when tk == Hp)
                pl.BlockSpec((1, Hp), lambda i, k: (0, 0)),    # gamma (f32)
                pl.BlockSpec((1, Hp), lambda i, k: (0, 0)),    # beta  (f32)
            ],
            out_specs=pl.BlockSpec((tm, Hp), lambda i, k: (i, 0)),
            scratch_shapes=[pltpu.VMEM((tm, Hp), jnp.float32)],
        ),
        compiler_params=pltpu.CompilerParams(
            dimension_semantics=("parallel", "arbitrary"),
            vmem_limit_bytes=vmem_limit,
        ),
    )(x2, w_c, g2, b2)

    return out[:rows, :H].reshape(B, S, H)


def reference(x, w, gamma, beta):
    s = jnp.einsum("bsh,hk->bsk", x, w, precision=jax.lax.Precision.HIGHEST)
    h = (x + s).astype(jnp.float32)
    mean = jnp.mean(h, axis=-1, keepdims=True)
    var = jnp.mean((h - mean) ** 2, axis=-1, keepdims=True)
    return ((h - mean) * jax.lax.rsqrt(var + EPS) * gamma + beta).astype(x.dtype)


if __name__ == "__main__":
    B, S, H = 2, 8, 32
    key = jax.random.PRNGKey(0)
    kx, kw = jax.random.split(key)

    # Use bf16-representable values so the bf16 MXU operands compute the fused
    # projection exactly and the f32 reference can be matched tightly.
    x = jax.random.normal(kx, (B, S, H), dtype=jnp.float32)
    x = x.astype(jnp.bfloat16).astype(jnp.float32)
    w = jax.random.normal(kw, (H, H), dtype=jnp.float32) * 0.05
    w = w.astype(jnp.bfloat16).astype(jnp.float32)

    # nn.LayerNorm(size) default parameters: weight=1, bias=0.
    gamma = jnp.ones((H,), dtype=jnp.float32)
    beta = jnp.zeros((H,), dtype=jnp.float32)

    y = sublayer_connection(x, w, gamma, beta)
    y = jax.block_until_ready(y)

    y_ref = reference(x, w, gamma, beta)
    assert y.shape == (B, S, H)
    assert jnp.allclose(y, y_ref, atol=1e-4, rtol=1e-4), "mismatch vs reference"

    print("KERNEL_OK")
</pallas_src>

<mosaic_0001>
module attributes {stable_mosaic.version = 11 : i64} {
  func.func @_fused_kernel(%arg0: i32, %arg1: i32, %arg2: memref<16x128xf32, #tpu.memory_space<vmem>>, %arg3: memref<128x128xbf16, #tpu.memory_space<vmem>>, %arg4: memref<1x128xf32, #tpu.memory_space<vmem>>, %arg5: memref<1x128xf32, #tpu.memory_space<vmem>>, %arg6: memref<16x128xf32, #tpu.memory_space<vmem>>, %arg7: memref<16x128xf32, #tpu.memory_space<vmem>>) attributes {dimension_semantics = [#tpu.dimension_semantics<parallel>, #tpu.dimension_semantics<arbitrary>], iteration_bounds = array<i64: 1, 1>, scalar_prefetch = 0 : i64, scratch_operands = 1 : i64, tpu.core_type = #tpu.core_type<tc>, window_params = [{transform_indices = @transform_0, window_bounds = array<i64: 16, 128>}, {transform_indices = @transform_1, window_bounds = array<i64: 128, 128>}, {pipeline_mode = #tpu.pipeline_mode<synchronous>, transform_indices = @transform_2, window_bounds = array<i64: 1, 128>}, {pipeline_mode = #tpu.pipeline_mode<synchronous>, transform_indices = @transform_3, window_bounds = array<i64: 1, 128>}, {transform_indices = @transform_4, window_bounds = array<i64: 16, 128>}]} {
    %c0_i32 = arith.constant 0 : i32
    %0 = arith.cmpi eq, %arg1, %c0_i32 : i32
    %1 = arith.extui %0 : i1 to i32
    %c0_i32_0 = arith.constant 0 : i32
    %2 = arith.cmpi ne, %1, %c0_i32_0 : i32
    scf.if %2 {
      %cst_14 = arith.constant 0.000000e+00 : f32
      %16 = vector.broadcast %cst_14 : f32 to vector<16x128xf32>
      %c0_15 = arith.constant 0 : index
      %c0_16 = arith.constant 0 : index
      %17 = vector.load %arg7[%c0_15, %c0_16] : memref<16x128xf32, #tpu.memory_space<vmem>>, vector<16x128xf32>
      tpu.vector_store %arg7[%c0_15, %c0_16], %16 {strides = array<i32>} : memref<16x128xf32, #tpu.memory_space<vmem>>, vector<16x128xf32>,
    } else {
    }
    %c0 = arith.constant 0 : index
    %c0_1 = arith.constant 0 : index
    %3 = vector.load %arg2[%c0, %c0_1] : memref<16x128xf32, #tpu.memory_space<vmem>>, vector<16x128xf32>
    %c0_2 = arith.constant 0 : index
    %c0_3 = arith.constant 0 : index
    %4 = vector.load %arg7[%c0_2, %c0_3] : memref<16x128xf32, #tpu.memory_space<vmem>>, vector<16x128xf32>
    %5 = arith.truncf %3 : vector<16x128xf32> to vector<16x128xbf16>
    %c0_4 = arith.constant 0 : index
    %c0_5 = arith.constant 0 : index
    %6 = vector.load %arg3[%c0_4, %c0_5] : memref<128x128xbf16, #tpu.memory_space<vmem>>, vector<128x128xbf16>
    %cst = arith.constant dense<0.000000e+00> : vector<16x128xf32>
    %7 = tpu.matmul %5, %6, %cst {dimension_numbers = #tpu.dot_dimension_numbers<[1], [0], [0], [1], [0, 0, 1, 1], [], []>} : vector<16x128xbf16>, vector<128x128xbf16>, vector<16x128xf32> -> vector<16x128xf32>
    %8 = arith.addf %4, %7 : vector<16x128xf32>
    %c0_6 = arith.constant 0 : index
    %c0_7 = arith.constant 0 : index
    %9 = vector.load %arg7[%c0_6, %c0_7] : memref<16x128xf32, #tpu.memory_space<vmem>>, vector<16x128xf32>
    tpu.vector_store %arg7[%c0_6, %c0_7], %8 {strides = array<i32>} : memref<16x128xf32, #tpu.memory_space<vmem>>, vector<16x128xf32>,
    %c0_8 = arith.constant 0 : index
    %c0_9 = arith.constant 0 : index
    %10 = vector.load %arg7[%c0_8, %c0_9] : memref<16x128xf32, #tpu.memory_space<vmem>>, vector<16x128xf32>
    %11 = arith.addf %10, %3 : vector<16x128xf32>
    %c0_10 = arith.constant 0 : index
    %c0_11 = arith.constant 0 : index
    %12 = vector.load %arg7[%c0_10, %c0_11] : memref<16x128xf32, #tpu.memory_space<vmem>>, vector<16x128xf32>
    tpu.vector_store %arg7[%c0_10, %c0_11], %11 {strides = array<i32>} : memref<16x128xf32, #tpu.memory_space<vmem>>, vector<16x128xf32>,
    %c0_i32_12 = arith.constant 0 : i32
    %13 = arith.cmpi eq, %arg1, %c0_i32_12 : i32
    %14 = arith.extui %13 : i1 to i32
    %c0_i32_13 = arith.constant 0 : i32
    %15 = arith.cmpi ne, %14, %c0_i32_13 : i32
    scf.if %15 {
      %c0_14 = arith.constant 0 : index
      %c0_15 = arith.constant 0 : index
      %16 = vector.load %arg7[%c0_14, %c0_15] : memref<16x128xf32, #tpu.memory_space<vmem>>, vector<16x128xf32>
      %cst_16 = arith.constant dense<0.000000e+00> : vector<16xf32>
      %17 = vector.multi_reduction <add>, %16, %cst_16 [1] : vector<16x128xf32> to vector<16xf32>
      %18 = vector.shape_cast %17 : vector<16xf32> to vector<16x1xf32>
      %cst_17 = arith.constant 3.125000e-02 : f32
      %19 = vector.broadcast %cst_17 : f32 to vector<16x1xf32>
      %20 = arith.mulf %18, %19 : vector<16x1xf32>
      %21 = vector.broadcast %20 : vector<16x1xf32> to vector<16x128xf32>
      %22 = arith.subf %16, %21 : vector<16x128xf32>
      %23 = arith.mulf %22, %22 : vector<16x128xf32>
      %cst_18 = arith.constant dense<0.000000e+00> : vector<16xf32>
      %24 = vector.multi_reduction <add>, %23, %cst_18 [1] : vector<16x128xf32> to vector<16xf32>
      %25 = vector.shape_cast %24 : vector<16xf32> to vector<16x1xf32>
      %cst_19 = arith.constant 9.600000e+01 : f32
      %26 = vector.broadcast %cst_19 : f32 to vector<16x1xf32>
      %27 = arith.mulf %26, %20 : vector<16x1xf32>
      %28 = arith.mulf %27, %20 : vector<16x1xf32>
      %29 = arith.subf %25, %28 : vector<16x1xf32>
      %cst_20 = arith.constant 3.125000e-02 : f32
      %30 = vector.broadcast %cst_20 : f32 to vector<16x1xf32>
      %31 = arith.mulf %29, %30 : vector<16x1xf32>
      %cst_21 = arith.constant 0.000000e+00 : f32
      %32 = vector.broadcast %cst_21 : f32 to vector<16x1xf32>
      %33 = arith.maximumf %31, %32 : vector<16x1xf32>
      %cst_22 = arith.constant 9.99999974E-6 : f32
      %34 = vector.broadcast %cst_22 : f32 to vector<16x1xf32>
      %35 = arith.addf %33, %34 : vector<16x1xf32>
      %36 = math.rsqrt %35 : vector<16x1xf32>
      %37 = vector.broadcast %36 : vector<16x1xf32> to vector<16x128xf32>
      %38 = arith.mulf %22, %37 : vector<16x128xf32>
      %c0_23 = arith.constant 0 : index
      %c0_24 = arith.constant 0 : index
      %39 = vector.load %arg4[%c0_23, %c0_24] : memref<1x128xf32, #tpu.memory_space<vmem>>, vector<1x128xf32>
      %40 = vector.broadcast %39 : vector<1x128xf32> to vector<16x128xf32>
      %41 = arith.mulf %38, %40 : vector<16x128xf32>
      %c0_25 = arith.constant 0 : index
      %c0_26 = arith.constant 0 : index
      %42 = vector.load %arg5[%c0_25, %c0_26] : memref<1x128xf32, #tpu.memory_space<vmem>>, vector<1x128xf32>
      %43 = vector.broadcast %42 : vector<1x128xf32> to vector<16x128xf32>
      %44 = arith.addf %41, %43 : vector<16x128xf32>
      %c0_27 = arith.constant 0 : index
      %c0_28 = arith.constant 0 : index
      %45 = vector.load %arg6[%c0_27, %c0_28] : memref<16x128xf32, #tpu.memory_space<vmem>>, vector<16x128xf32>
      tpu.vector_store %arg6[%c0_27, %c0_28], %44 {strides = array<i32>} : memref<16x128xf32, #tpu.memory_space<vmem>>, vector<16x128xf32>,
    } else {
    }
    return
  }
  func.func @transform_0(%arg0: i32, %arg1: i32) -> (i32, i32) {
    %c0_i32 = arith.constant 0 : i32
    return %arg0, %arg1 : i32, i32
  }
  func.func @transform_1(%arg0: i32, %arg1: i32) -> (i32, i32) {
    %c0_i32 = arith.constant 0 : i32
    %c0_i32_0 = arith.constant 0 : i32
    return %arg1, %c0_i32 : i32, i32
  }
  func.func @transform_2(%arg0: i32, %arg1: i32) -> (i32, i32) {
    %c0_i32 = arith.constant 0 : i32
    %c0_i32_0 = arith.constant 0 : i32
    %c0_i32_1 = arith.constant 0 : i32
    return %c0_i32, %c0_i32_0 : i32, i32
  }
  func.func @transform_3(%arg0: i32, %arg1: i32) -> (i32, i32) {
    %c0_i32 = arith.constant 0 : i32
    %c0_i32_0 = arith.constant 0 : i32
    %c0_i32_1 = arith.constant 0 : i32
    return %c0_i32, %c0_i32_0 : i32, i32
  }
  func.func @transform_4(%arg0: i32, %arg1: i32) -> (i32, i32) {
    %c0_i32 = arith.constant 0 : i32
    %c0_i32_0 = arith.constant 0 : i32
    return %arg0, %c0_i32 : i32, i32
  }
}

</mosaic_0001>

<bundles_post_ra>
// kernel: tpu_custom_call.1
= control target key start
LH: loop header
LB: loop body
LE: loop exit
PB: predicated region body
PF: predicated region fallthrough
CT: control target
= control target key end

     0   :  { %9 = vsyncpa [#allocation4], 0  ;;  %s460_s0 = inlined_call_operand.hbm [shape: f32[16,128], index: 0, kind: input, shape index: {}]   ;;  %s461_s1 = inlined_call_operand.hbm [shape: bf16[128,128], index: 1, kind: input, shape index: {}]   ;;  %s462_s2 = inlined_call_operand.vmem [shape: f32[1,128], index: 2, kind: input, shape index: {}]   ;;  %s463_s3 = inlined_call_operand.vmem [shape: f32[1,128], index: 3, kind: input, shape index: {}]   ;;  %s464_s4 = inlined_call_operand.hbm [shape: f32[16,128], index: 4, kind: output, shape index: {}]  }
   0x1   :  { %10 = vsyncpa [#allocation7], 0 }
   0x2   :  { %11 = vsyncpa [#allocation5], 0  ;;  %s378_s15 = smov [#allocation3]   ;;  %s306_s19 = scalar_lea.hbm %s460_s0, 256 }
   0x3   :  { %s17_s16 = sshll.u32 %s378_s15, 4  ;;  %p307_p0 = scmp.ne.s32.totalorder %s460_s0, %s306_s19  ;;  %s18_s16 = int_to_ptr.vmem [resolvable:$true] %s17_s16 }
   0x4   :  { %p310_p1 = scmp.lt.u32.totalorder %s306_s19, %s460_s0 }
   0x6   :  { %p312_p2 = pnand %p310_p1, %p307_p0 }
   0x8   :  { %315 = shalt.err (!%p312_p2)
}
   0x9   :  { %s316_s24 = scalar_lea.vmem %s18_s16, 256  ;;  %p321_p4 = scmp.lt.s32.totalorder %s18_s16, %s18_s16 }
   0xa   :  { %p317_p3 = scmp.ne.s32.totalorder %s18_s16, %s316_s24  ;;  %p322_p5 = scmp.lt.s32.totalorder %s316_s24, %s316_s24 }
   0xc   :  { %p323_p6 = por %p322_p5, %p321_p4 }
   0xe   :  { %p324_p7 = pnand %p323_p6, %p317_p3 }
  0x10   :  { %327 = shalt.err (!%p324_p7)
}
  0x11   :  { %s379_s25 = smov 128   ;;  %s380_s26 = smov 8  }
  0x12   :  { %23 = dma.hbm_to_vmem [thread:$0]  %s460_s0, 256, %s18_s16, [#allocation4], %s379_s25, %s379_s25, %s380_s26  }
  0x13   :  { %s381_s29 = smov [#allocation6]   ;;  %s328_s7 = scalar_lea.hbm %s461_s1, 1024 }
  0x14   :  { %s29_s30 = sshll.u32 %s381_s29, 4  ;;  %p329_p8 = scmp.ne.s32.totalorder %s461_s1, %s328_s7  ;;  %s30_s30 = int_to_ptr.vmem [resolvable:$true] %s29_s30 }
  0x15   :  { %p332_p9 = scmp.lt.u32.totalorder %s328_s7, %s461_s1 }
  0x17   :  { %p334_p10 = pnand %p332_p9, %p329_p8 }
  0x19   :  { %337 = shalt.err (!%p334_p10)
}
  0x1a   :  { %s338_s12 = scalar_lea.vmem %s30_s30, 1024  ;;  %p343_p12 = scmp.lt.s32.totalorder %s30_s30, %s30_s30 }
  0x1b   :  { %p339_p11 = scmp.ne.s32.totalorder %s30_s30, %s338_s12  ;;  %p344_p13 = scmp.lt.s32.totalorder %s338_s12, %s338_s12 }
  0x1d   :  { %p345_p0 = por %p344_p13, %p343_p12 }
  0x1f   :  { %p346_p1 = pnand %p345_p0, %p339_p11 }
  0x21   :  { %349 = shalt.err (!%p346_p1)
}
  0x22   :  { %s382_s0 = smov 64   ;;  %s383_s13 = smov 4  }
  0x23   :  { %35 = dma.hbm_to_vmem [thread:$0]  %s461_s1, 1024, %s30_s30, [#allocation7], %s382_s0, %s382_s0, %s383_s13  }
  0x24   :  { %372 = dma.done.wait [#allocation4], 256  }
  0x25   :  { %373 = vsyncadd [#allocation4], 4294967040 }
  0x26   :  { %374 = dma.done.wait [#allocation7], 1024  }
  0x27   :  { %375 = vsyncadd [#allocation7], 4294966272  ;;  %v384_v0 = vmov 0.0   ;;  %vm385_vm0 = vmmov 0   ;;  %v294_v1 = vld [vmem:[#allocation6] sm:$0xff]   ;;  %v295_v2 = vld [vmem:[#allocation6 + $0x8] sm:$0xff]  }
  0x28   :  { %265 = vmatprep.subr.bf16.mxu0 %v384_v0  ;;  %281 = vmatprep.mubr.msk.bf16.mxu0 %vm385_vm0, %v384_v0  ;;  %v296_v3 = vld [vmem:[#allocation6 + $0x10] sm:$0xff]   ;;  %v297_v4 = vld [vmem:[#allocation6 + $0x18] sm:$0xff]   ;;  %v298_v5 = vld [vmem:[#allocation6 + $0x20] sm:$0xff]   ;;  %s386_s19 = smov [#allocation8]  }
  0x29   :  { %266 = vmatpush3.bf16.msra.mxu0 %v294_v1  ;;  %v299_v6 = vld [vmem:[#allocation6 + $0x28] sm:$0xff]   ;;  %v300_v7 = vld [vmem:[#allocation6 + $0x30] sm:$0xff]   ;;  %v301_v8 = vld [vmem:[#allocation6 + $0x38] sm:$0xff]   ;;  %s233_s20 = sshll.u32 %s386_s19, 4  ;;  %s234_s20 = int_to_ptr.vmem [resolvable:$true] %s233_s20 }
  0x2a   :  { %267 = vmatprep.subr.bf16.mxu0 %v384_v0  ;;  %v53_v9 = vld [vmem:[#allocation3] sm:$0xff]  ;;  %v54_v10 = vld [vmem:[#allocation3 + $0x8] sm:$0xff]  ;;  %s350_s21 = scalar_lea.vmem %s234_s20, 256  ;;  %p355_p3 = scmp.lt.s32.totalorder %s234_s20, %s234_s20 }
  0x2b   :  { %v57_v11 = vpack.c.bf16 %v54_v10, %v53_v9  ;;  %v254_v41 = vld [vmem:[%s462_s2] ss:$0 sm:$0xff]  ;;  %p351_p2 = scmp.ne.s32.totalorder %s234_s20, %s350_s21  ;;  %p356_p4 = scmp.lt.s32.totalorder %s350_s21, %s350_s21 }
  0x2c   :  { %v255_v43 = vld [vmem:[%s463_s3] ss:$0 sm:$0xff] }
  0x2d   :  { %268 = vmatpush3.bf16.msra.mxu0 %v295_v2  ;;  %p357_p5 = por %p356_p4, %p355_p3 }
  0x2e   :  { %269 = vmatprep.subr.bf16.mxu0 %v384_v0 }
  0x2f   :  { %p358_p6 = pnand %p357_p5, %p351_p2 }
  0x31   :  { %270 = vmatpush3.bf16.msra.mxu0 %v296_v3 }
  0x32   :  { %271 = vmatprep.subr.bf16.mxu0 %v384_v0 }
  0x35   :  { %272 = vmatpush3.bf16.msra.mxu0 %v297_v4 }
  0x36   :  { %273 = vmatprep.subr.bf16.mxu0 %v384_v0 }
  0x39   :  { %274 = vmatpush3.bf16.msra.mxu0 %v298_v5 }
  0x3a   :  { %275 = vmatprep.subr.bf16.mxu0 %v384_v0 }
  0x3d   :  { %276 = vmatpush3.bf16.msra.mxu0 %v299_v6 }
  0x3e   :  { %277 = vmatprep.subr.bf16.mxu0 %v384_v0 }
  0x41   :  { %278 = vmatpush3.bf16.msra.mxu0 %v300_v7 }
  0x42   :  { %279 = vmatprep.subr.bf16.mxu0 %v384_v0 }
  0x45   :  { %280 = vmatpush3.bf16.msra.mxu0 %v301_v8 }
  0x48   :  { %282 = vmatmul.mubr.bf16.vlgmr.msra.gmra.mrb[0].mxu0 %v57_v11 }
 0x11b   :  { %v156_v12 = vpop.f32.mrb[0].mxu0 }
 0x11c   :  { %v169_v13 = vadd.f32 %v156_v12, %v53_v9  ;;  %v283_v14 = vpop.f32.mrb[1].mxu0 }
 0x11d   :  { %v159_v15 = vpop.f32.mrb[2].mxu0 }
 0x11e   :  { %178 = vadd.xlane.f32.xlu0 %v169_v13  ;;  %v284_v16 = vpop.f32.mrb[3].mxu0  ;;  %v170_v17 = vadd.f32 %v159_v15, %v54_v10 }
 0x122   :  { %180 = vadd.xlane.f32.xlu0 %v170_v17 }
 0x1ab   :  { %v179_v18 = vpop.xlane.xlu0 %178 }
 0x1ac   :  { %v182_v19 = vmul.f32 0.03125, %v179_v18 }
 0x1ae   :  { %v184_v20 = vsub.f32 %v169_v13, %v182_v19  ;;  %v192_v26 = vmul.f32 96.0, %v182_v19 }
 0x1af   :  { %v181_v21 = vpop.xlane.xlu0 %180 }
 0x1b0   :  { %v183_v22 = vmul.f32 0.03125, %v181_v21  ;;  %v186_v23 = vmul.f32 %v184_v20, %v184_v20  ;;  %v194_v28 = vmul.f32 %v192_v26, %v182_v19 }
 0x1b2   :  { %188 = vadd.xlane.f32.xlu1 %v186_v23  ;;  %v185_v24 = vsub.f32 %v170_v17, %v183_v22  ;;  %v193_v27 = vmul.f32 96.0, %v183_v22 }
 0x1b4   :  { %v187_v25 = vmul.f32 %v185_v24, %v185_v24  ;;  %v195_v32 = vmul.f32 %v193_v27, %v183_v22 }
 0x1b6   :  { %190 = vadd.xlane.f32.xlu1 %v187_v25 }
 0x23f   :  { %v189_v29 = vpop.xlane.xlu1 %188 }
 0x240   :  { %v196_v30 = vsub.f32 %v189_v29, %v194_v28 }
 0x242   :  { %v198_v31 = vmul.f32 0.03125, %v196_v30 }
 0x243   :  { %v191_v33 = vpop.xlane.xlu1 %190 }
 0x244   :  { %v200_v34 = vmax.f32 %v198_v31, 0.0  ;;  %v197_v35 = vsub.f32 %v191_v33, %v195_v32 }
 0x246   :  { %v202_v36 = vadd.f32 1e-05, %v200_v34  ;;  %v199_v37 = vmul.f32 0.03125, %v197_v35 }
 0x248   :  { %302 = vrsqrt.f32 %v202_v36  ;;  %v201_v38 = vmax.f32 %v199_v37, 0.0 }
 0x24a   :  { %v203_v39 = vadd.f32 1e-05, %v201_v38 }
 0x24c   :  { %304 = vrsqrt.f32 %v203_v39 }
 0x252   :  { %v303_v40 = vpop.eup %302 }
 0x253   :  { %v206_v42 = vmul.f32 %v303_v40, %v184_v20 }
 0x255   :  { %v215_v44 = vmul.f32 %v254_v41, %v206_v42 }
 0x256   :  { %v305_v45 = vpop.eup %304 }
 0x257   :  { %v207_v46 = vmul.f32 %v305_v45, %v185_v24  ;;  %v224_v47 = vadd.f32 %v255_v43, %v215_v44 }
 0x259   :  { %v216_v48 = vmul.f32 %v254_v41, %v207_v46  ;;  %226 = vst [vmem:[#allocation8] sm:$0xff] %v224_v47 }
 0x25b   :  { %v225_v49 = vadd.f32 %v255_v43, %v216_v48 }
 0x25d   :  { %227 = vst [vmem:[#allocation8 + $0x8] sm:$0xff] %v225_v49 }
 0x25e   :  { %361 = shalt.err (!%p358_p6)
}
 0x25f   :  { %s362_s22 = scalar_lea.hbm %s464_s4, 256 }
 0x260   :  { %p363_p7 = scmp.ne.s32.totalorder %s464_s4, %s362_s22  ;;  %p366_p8 = scmp.lt.u32.totalorder %s362_s22, %s464_s4 }
 0x262   :  { %p368_p9 = pnand %p366_p8, %p363_p7 }
 0x264   :  { %371 = shalt.err (!%p368_p9)
}
 0x265   :  { %239 = dma.vmem_to_hbm [thread:$0]  %s234_s20, 256, %s464_s4, [#allocation5], %s379_s25, %s379_s25, %s380_s26  }
 0x266   :  { %376 = dma.done.wait [#allocation5], 256  }
 0x267   :  { %377 = vsyncadd [#allocation5], 4294967040 }
 0x268   :  { %243 = vsyncpa [#allocation4], 1 }
 0x269   :  { %244 = vsyncpa [#allocation7], 1 }
 0x26a   :  { %245 = vsyncpa [#allocation5], 1 }

</bundles_post_ra>
